<compile_context>
chip_gen: v6e
topology: v6e:2x2x1
jax: 0.10.0
libtpu: 0.0.40
codegen_flags: <defaults>
</compile_context>

<pallas_src>
import math

import jax
import jax.numpy as jnp
from jax import lax
from jax.experimental import pallas as pl
from jax.experimental.pallas import tpu as pltpu


def _round_up(x, m):
    return ((x + m - 1) // m) * m


def _make_taylor_ce_kernel(class_axis, n_taylor, ignore_index):
    """class_axis: axis of the class dimension inside the kernel block
    (1 = classes on lanes, 0 = classes on sublanes / batch on lanes)."""
    inv_fact = [1.0 / math.factorial(i) for i in range(n_taylor + 1)]

    def kernel(labels_ref, logits_ref, loss_ref, cnt_ref):
        step = pl.program_id(1)

        @pl.when(step == 0)
        def _():
            loss_ref[...] = jnp.zeros_like(loss_ref)
            cnt_ref[...] = jnp.zeros_like(cnt_ref)

        x = logits_ref[...].astype(jnp.float32)   # (tile, C) or (C, tile)
        labels = labels_ref[...]                   # (tile, 1) or (1, tile) int32

        # Taylor-softmax numerator via Horner: fn = sum_{i=0..n} x^i / i!
        fn = jnp.full_like(x, inv_fact[n_taylor])
        for i in range(n_taylor - 1, -1, -1):
            fn = fn * x + inv_fact[i]

        denom = jnp.sum(fn, axis=class_axis, keepdims=True)

        # Gather the target-class numerator BEFORE the log (2 logs per row,
        # not C).  One-hot compare instead of dynamic gather.
        class_ids = lax.broadcasted_iota(jnp.int32, x.shape, class_axis)
        onehot = class_ids == labels
        picked_fn = jnp.sum(jnp.where(onehot, fn, 0.0),
                            axis=class_axis, keepdims=True)

        valid = labels != ignore_index
        valid_f = valid.astype(jnp.float32)
        # ignored / padded rows never match any class -> picked_fn == 0;
        # guard the log so 0 * (-inf) never produces NaN.
        safe_picked = jnp.where(valid, picked_fn, 1.0)
        loss_rows = (jnp.log(denom) - jnp.log(safe_picked)) * valid_f

        loss_ref[...] += jnp.sum(loss_rows, keepdims=True).reshape(1, 1, 1)
        cnt_ref[...] += jnp.sum(valid_f, keepdims=True).reshape(1, 1, 1)

    return kernel


def taylor_cross_entropy_loss(logits, labels, *, n=2, ignore_index=-1,
                              reduction="mean", num_parallel=2,
                              downcast_to_bf16=False,
                              vmem_budget_per_buffer=8 * 1024 * 1024):
    """logits: (N, C) or (B, C, *spatial); labels: (N,) or (B, *spatial).
    Returns the scalar Taylor cross-entropy loss ('mean' or 'sum')."""
    assert n % 2 == 0, "Taylor order n must be even"
    assert reduction in ("mean", "sum")

    # Flatten any spatial dims (PyTorch nll_loss convention: classes on axis 1).
    if logits.ndim > 2:
        C = logits.shape[1]
        logits = jnp.moveaxis(logits, 1, -1).reshape(-1, C)
        labels = labels.reshape(-1)
    N, C = logits.shape
    labels = labels.reshape(N).astype(jnp.int32)

    if downcast_to_bf16 and logits.dtype == jnp.float32:
        logits = logits.astype(jnp.bfloat16)   # halve HBM traffic; kernel upcasts

    bytes_per_elem = jnp.dtype(logits.dtype).itemsize

    # Layout: put the dense batch axis on the 128-lane axis when C is small,
    # otherwise keep the standard (rows, classes) layout with classes on lanes.
    class_axis = 0 if C < 128 else 1
    row_align = 128 if class_axis == 0 else 8

    # Biggest aligned batch tile that keeps the double-buffered logits block
    # within the VMEM budget.
    max_rows = max(row_align, vmem_budget_per_buffer // max(1, C * bytes_per_elem))
    tile = min(1024, max_rows)
    tile = max(row_align, (tile // row_align) * row_align)
    tile = min(tile, _round_up(N, row_align))

    tiles_total = pl.cdiv(N, tile)
    num_parallel = max(1, min(num_parallel, tiles_total))
    tiles_total = _round_up(tiles_total, num_parallel)
    tiles_per_core = tiles_total // num_parallel
    n_pad = tiles_total * tile

    if class_axis == 0:
        # (C, N_pad): batch on lanes.  Padded columns get label=ignore_index.
        logits_in = jnp.pad(logits.T, ((0, 0), (0, n_pad - N)))
        labels_in = jnp.pad(labels.reshape(1, N), ((0, 0), (0, n_pad - N)),
                            constant_values=ignore_index)
        logits_spec = pl.BlockSpec((C, tile), lambda c, i: (0, c * tiles_per_core + i))
        labels_spec = pl.BlockSpec((1, tile), lambda c, i: (0, c * tiles_per_core + i))
    else:
        # (N_pad, C): classes on lanes.
        logits_in = jnp.pad(logits, ((0, n_pad - N), (0, 0)))
        labels_in = jnp.pad(labels.reshape(N, 1), ((0, n_pad - N), (0, 0)),
                            constant_values=ignore_index)
        logits_spec = pl.BlockSpec((tile, C), lambda c, i: (c * tiles_per_core + i, 0))
        labels_spec = pl.BlockSpec((tile, 1), lambda c, i: (c * tiles_per_core + i, 0))

    kernel = _make_taylor_ce_kernel(class_axis, n, ignore_index)

    acc_shape = jax.ShapeDtypeStruct((num_parallel, 1, 1), jnp.float32)
    acc_spec = pl.BlockSpec((1, 1, 1), lambda c, i: (c, 0, 0))

    loss_sum, count = pl.pallas_call(
        kernel,
        out_shape=(acc_shape, acc_shape),
        grid_spec=pltpu.PrefetchScalarGridSpec(
            num_scalar_prefetch=0,
            grid=(num_parallel, tiles_per_core),
            in_specs=[labels_spec, logits_spec],
            out_specs=(acc_spec, acc_spec),
        ),
        compiler_params=pltpu.CompilerParams(
            dimension_semantics=("parallel", "arbitrary"),
            vmem_limit_bytes=32 * 1024 * 1024,
        ),
    )(labels_in, logits_in)

    total_loss = jnp.sum(loss_sum)
    if reduction == "sum":
        return total_loss
    # 'mean' over non-ignored samples (NaN if all ignored, like PyTorch).
    return total_loss / jnp.sum(count)


def _reference(logits, labels, *, n=2, ignore_index=-1):
    """Pure-JAX mirror of TaylorCrossEntropyLoss.forward for verification."""
    if logits.ndim > 2:
        C = logits.shape[1]
        logits = jnp.moveaxis(logits, 1, -1).reshape(-1, C)
        labels = labels.reshape(-1)
    x = logits.astype(jnp.float32)
    fn = jnp.ones_like(x)
    denor = 1.0
    for i in range(1, n + 1):
        denor *= float(i)
        fn = fn + x ** i / denor
    probs = fn / jnp.sum(fn, axis=1, keepdims=True)
    log_probs = jnp.log(probs)
    valid = labels != ignore_index
    safe = jnp.where(valid, labels, 0)
    picked = jnp.take_along_axis(log_probs, safe[:, None], axis=1)[:, 0]
    return -jnp.sum(picked * valid) / jnp.sum(valid)


if __name__ == "__main__":
    key = jax.random.PRNGKey(0)
    k1, k2, k3, k4, k5, k6 = jax.random.split(key, 6)

    # Case 1: (N, C) like nn.CrossEntropyLoss, small C -> lane-dense (C, N) layout.
    N1, C1 = 16, 10
    logits1 = jax.random.normal(k1, (N1, C1), dtype=jnp.float32)
    labels1 = jax.random.randint(k2, (N1,), 0, C1, dtype=jnp.int32)
    labels1 = labels1.at[3].set(-1)                       # exercise ignore_index
    out1 = jax.block_until_ready(taylor_cross_entropy_loss(logits1, labels1))
    ref1 = jax.block_until_ready(_reference(logits1, labels1))
    assert jnp.allclose(out1, ref1, rtol=1e-4, atol=1e-5), (out1, ref1)

    # Case 1b: same data with the bf16 HBM-side downcast (loose tolerance).
    out1b = jax.block_until_ready(
        taylor_cross_entropy_loss(logits1, labels1, downcast_to_bf16=True))
    assert jnp.allclose(out1b, ref1, rtol=5e-2, atol=5e-2), (out1b, ref1)

    # Case 2: larger C -> classes-on-lanes layout; ragged N, multi-tile grid,
    # 2 "parallel" accumulator rows (tiny VMEM budget forces several tiles).
    N2, C2 = 50, 384
    logits2 = jax.random.normal(k3, (N2, C2), dtype=jnp.float32)
    labels2 = jax.random.randint(k4, (N2,), 0, C2, dtype=jnp.int32)
    labels2 = labels2.at[0].set(-1)
    out2 = jax.block_until_ready(
        taylor_cross_entropy_loss(logits2, labels2,
                                  vmem_budget_per_buffer=16 * 1024))
    ref2 = jax.block_until_ready(_reference(logits2, labels2))
    assert jnp.allclose(out2, ref2, rtol=1e-4, atol=1e-5), (out2, ref2)

    # Case 3: spatial logits (B, C, H, W) + labels (B, H, W) as in the docstring.
    B, C3, H, W = 2, 10, 8, 8
    logits3 = jax.random.normal(k5, (B, C3, H, W), dtype=jnp.float32)
    labels3 = jax.random.randint(k6, (B, H, W), 0, C3, dtype=jnp.int32)
    out3 = jax.block_until_ready(taylor_cross_entropy_loss(logits3, labels3))
    ref3 = jax.block_until_ready(_reference(logits3, labels3))
    assert jnp.allclose(out3, ref3, rtol=1e-4, atol=1e-5), (out3, ref3)

    print("KERNEL_OK")
</pallas_src>

<mosaic_0001>
module attributes {stable_mosaic.version = 11 : i64} {
  func.func @kernel(%arg0: i32, %arg1: i32, %arg2: memref<1x128xi32, #tpu.memory_space<vmem>>, %arg3: memref<10x128xf32, #tpu.memory_space<vmem>>, %arg4: memref<1x1x1xf32, #tpu.memory_space<vmem>>, %arg5: memref<1x1x1xf32, #tpu.memory_space<vmem>>) attributes {dimension_semantics = [#tpu.dimension_semantics<parallel>, #tpu.dimension_semantics<arbitrary>], iteration_bounds = array<i64: 1, 1>, scalar_prefetch = 0 : i64, scratch_operands = 0 : i64, tpu.core_type = #tpu.core_type<tc>, window_params = [{transform_indices = @transform_0, window_bounds = array<i64: 1, 128>}, {transform_indices = @transform_1, window_bounds = array<i64: 10, 128>}, {transform_indices = @transform_2, window_bounds = array<i64: 1, 1, 1>}, {transform_indices = @transform_3, window_bounds = array<i64: 1, 1, 1>}]} {
    %c0_i32 = arith.constant 0 : i32
    %0 = arith.cmpi eq, %arg1, %c0_i32 : i32
    %1 = arith.extui %0 : i1 to i32
    %c0_i32_0 = arith.constant 0 : i32
    %2 = arith.cmpi ne, %1, %c0_i32_0 : i32
    scf.if %2 {
      %cst_24 = arith.constant 0.000000e+00 : f32
      %49 = vector.broadcast %cst_24 : f32 to vector<1x1x1xf32>
      %c0_25 = arith.constant 0 : index
      %c0_26 = arith.constant 0 : index
      %c0_27 = arith.constant 0 : index
      %50 = vector.load %arg4[%c0_25, %c0_26, %c0_27] : memref<1x1x1xf32, #tpu.memory_space<vmem>>, vector<1x1x1xf32>
      tpu.vector_store %arg4[%c0_25, %c0_26, %c0_27], %49 {strides = array<i32>} : memref<1x1x1xf32, #tpu.memory_space<vmem>>, vector<1x1x1xf32>,
      %cst_28 = arith.constant 0.000000e+00 : f32
      %51 = vector.broadcast %cst_28 : f32 to vector<1x1x1xf32>
      %c0_29 = arith.constant 0 : index
      %c0_30 = arith.constant 0 : index
      %c0_31 = arith.constant 0 : index
      %52 = vector.load %arg5[%c0_29, %c0_30, %c0_31] : memref<1x1x1xf32, #tpu.memory_space<vmem>>, vector<1x1x1xf32>
      tpu.vector_store %arg5[%c0_29, %c0_30, %c0_31], %51 {strides = array<i32>} : memref<1x1x1xf32, #tpu.memory_space<vmem>>, vector<1x1x1xf32>,
    } else {
    }
    %c0 = arith.constant 0 : index
    %c0_1 = arith.constant 0 : index
    %3 = vector.load %arg3[%c0, %c0_1] : memref<10x128xf32, #tpu.memory_space<vmem>>, vector<10x128xf32>
    %c0_2 = arith.constant 0 : index
    %c0_3 = arith.constant 0 : index
    %4 = vector.load %arg2[%c0_2, %c0_3] : memref<1x128xi32, #tpu.memory_space<vmem>>, vector<1x128xi32>
    %cst = arith.constant 5.000000e-01 : f32
    %5 = vector.broadcast %cst : f32 to vector<10x128xf32>
    %6 = arith.mulf %5, %3 : vector<10x128xf32>
    %cst_4 = arith.constant 1.000000e+00 : f32
    %7 = vector.broadcast %cst_4 : f32 to vector<10x128xf32>
    %8 = arith.addf %6, %7 : vector<10x128xf32>
    %9 = arith.mulf %8, %3 : vector<10x128xf32>
    %cst_5 = arith.constant 1.000000e+00 : f32
    %10 = vector.broadcast %cst_5 : f32 to vector<10x128xf32>
    %11 = arith.addf %9, %10 : vector<10x128xf32>
    %cst_6 = arith.constant dense<0.000000e+00> : vector<128xf32>
    %12 = vector.multi_reduction <add>, %11, %cst_6 [0] : vector<10x128xf32> to vector<128xf32>
    %13 = vector.shape_cast %12 : vector<128xf32> to vector<1x128xf32>
    %14 = tpu.iota {dimensions = array<i32: 0>} : vector<10x128xi32>
    %15 = vector.broadcast %4 : vector<1x128xi32> to vector<10x128xi32>
    %16 = arith.cmpi eq, %14, %15 : vector<10x128xi32>
    %cst_7 = arith.constant 0.000000e+00 : f32
    %17 = vector.broadcast %cst_7 : f32 to vector<10x128xf32>
    %18 = arith.select %16, %11, %17 : vector<10x128xi1>, vector<10x128xf32>
    %cst_8 = arith.constant dense<0.000000e+00> : vector<128xf32>
    %19 = vector.multi_reduction <add>, %18, %cst_8 [0] : vector<10x128xf32> to vector<128xf32>
    %20 = vector.shape_cast %19 : vector<128xf32> to vector<1x128xf32>
    %c-1_i32 = arith.constant -1 : i32
    %21 = vector.broadcast %c-1_i32 : i32 to vector<1x128xi32>
    %22 = arith.cmpi ne, %4, %21 : vector<1x128xi32>
    %23 = arith.extui %22 : vector<1x128xi1> to vector<1x128xi32>
    %24 = arith.sitofp %23 : vector<1x128xi32> to vector<1x128xf32>
    %cst_9 = arith.constant 1.000000e+00 : f32
    %25 = vector.broadcast %cst_9 : f32 to vector<1x128xf32>
    %26 = arith.select %22, %20, %25 : vector<1x128xi1>, vector<1x128xf32>
    %27 = math.log %13 : vector<1x128xf32>
    %28 = math.log %26 : vector<1x128xf32>
    %29 = arith.subf %27, %28 : vector<1x128xf32>
    %30 = arith.mulf %29, %24 : vector<1x128xf32>
    %c0_10 = arith.constant 0 : index
    %c0_11 = arith.constant 0 : index
    %c0_12 = arith.constant 0 : index
    %31 = vector.load %arg4[%c0_10, %c0_11, %c0_12] : memref<1x1x1xf32, #tpu.memory_space<vmem>>, vector<1x1x1xf32>
    %32 = vector.shape_cast %30 : vector<1x128xf32> to vector<1x1x128xf32>
    %cst_13 = arith.constant dense<0.000000e+00> : vector<1xf32>
    %33 = vector.multi_reduction <add>, %32, %cst_13 [1, 2] : vector<1x1x128xf32> to vector<1xf32>
    %34 = vector.shape_cast %33 : vector<1xf32> to vector<1x1x1xf32>
    %35 = vector.extract %34[0, 0, 0] : f32 from vector<1x1x1xf32>
    %36 = vector.broadcast %35 : f32 to vector<1x1xf32>
    %37 = vector.shape_cast %36 : vector<1x1xf32> to vector<1x1x1xf32>
    %38 = arith.addf %31, %37 : vector<1x1x1xf32>
    %c0_14 = arith.constant 0 : index
    %c0_15 = arith.constant 0 : index
    %c0_16 = arith.constant 0 : index
    %39 = vector.load %arg4[%c0_14, %c0_15, %c0_16] : memref<1x1x1xf32, #tpu.memory_space<vmem>>, vector<1x1x1xf32>
    tpu.vector_store %arg4[%c0_14, %c0_15, %c0_16], %38 {strides = array<i32>} : memref<1x1x1xf32, #tpu.memory_space<vmem>>, vector<1x1x1xf32>,
    %c0_17 = arith.constant 0 : index
    %c0_18 = arith.constant 0 : index
    %c0_19 = arith.constant 0 : index
    %40 = vector.load %arg5[%c0_17, %c0_18, %c0_19] : memref<1x1x1xf32, #tpu.memory_space<vmem>>, vector<1x1x1xf32>
    %41 = vector.shape_cast %24 : vector<1x128xf32> to vector<1x1x128xf32>
    %cst_20 = arith.constant dense<0.000000e+00> : vector<1xf32>
    %42 = vector.multi_reduction <add>, %41, %cst_20 [1, 2] : vector<1x1x128xf32> to vector<1xf32>
    %43 = vector.shape_cast %42 : vector<1xf32> to vector<1x1x1xf32>
    %44 = vector.extract %43[0, 0, 0] : f32 from vector<1x1x1xf32>
    %45 = vector.broadcast %44 : f32 to vector<1x1xf32>
    %46 = vector.shape_cast %45 : vector<1x1xf32> to vector<1x1x1xf32>
    %47 = arith.addf %40, %46 : vector<1x1x1xf32>
    %c0_21 = arith.constant 0 : index
    %c0_22 = arith.constant 0 : index
    %c0_23 = arith.constant 0 : index
    %48 = vector.load %arg5[%c0_21, %c0_22, %c0_23] : memref<1x1x1xf32, #tpu.memory_space<vmem>>, vector<1x1x1xf32>
    tpu.vector_store %arg5[%c0_21, %c0_22, %c0_23], %47 {strides = array<i32>} : memref<1x1x1xf32, #tpu.memory_space<vmem>>, vector<1x1x1xf32>,
    return
  }
  func.func @transform_0(%arg0: i32, %arg1: i32) -> (i32, i32) {
    %c1_i32 = arith.constant 1 : i32
    %0 = arith.muli %arg0, %c1_i32 : i32
    %1 = arith.addi %0, %arg1 : i32
    %c0_i32 = arith.constant 0 : i32
    %c0_i32_0 = arith.constant 0 : i32
    return %c0_i32, %1 : i32, i32
  }
  func.func @transform_1(%arg0: i32, %arg1: i32) -> (i32, i32) {
    %c1_i32 = arith.constant 1 : i32
    %0 = arith.muli %arg0, %c1_i32 : i32
    %1 = arith.addi %0, %arg1 : i32
    %c0_i32 = arith.constant 0 : i32
    %c0_i32_0 = arith.constant 0 : i32
    return %c0_i32, %1 : i32, i32
  }
  func.func @transform_2(%arg0: i32, %arg1: i32) -> (i32, i32, i32) {
    %c0_i32 = arith.constant 0 : i32
    %c0_i32_0 = arith.constant 0 : i32
    %c0_i32_1 = arith.constant 0 : i32
    return %arg0, %c0_i32, %c0_i32_0 : i32, i32, i32
  }
  func.func @transform_3(%arg0: i32, %arg1: i32) -> (i32, i32, i32) {
    %c0_i32 = arith.constant 0 : i32
    %c0_i32_0 = arith.constant 0 : i32
    %c0_i32_1 = arith.constant 0 : i32
    return %arg0, %c0_i32, %c0_i32_0 : i32, i32, i32
  }
}

</mosaic_0001>

<bundles_post_ra>
// kernel: tpu_custom_call.1
= control target key start
LH: loop header
LB: loop body
LE: loop exit
PB: predicated region body
PF: predicated region fallthrough
CT: control target
= control target key end

     0   :  { %9 = vsyncpa [#allocation3], 0  ;;  %s312_s0 = inlined_call_operand.hbm [shape: s32[1,128], index: 0, kind: input, shape index: {}]   ;;  %s313_s1 = inlined_call_operand.hbm [shape: f32[10,128], index: 1, kind: input, shape index: {}]   ;;  %s314_s2 = inlined_call_operand.hbm [shape: f32[1,1,1], index: 2, kind: output, shape index: {0}]   ;;  %s315_s3 = inlined_call_operand.hbm [shape: f32[1,1,1], index: 3, kind: output, shape index: {1}]  }
   0x1   :  { %10 = vsyncpa [#allocation6], 0 }
   0x2   :  { %11 = vsyncpa [#allocation4], 0 }
   0x3   :  { %12 = vsyncpa [#allocation9], 0  ;;  %s269_s12 = smov [#allocation2]   ;;  %s270_s14 = smov [#allocation5]  }
   0x4   :  { %s22_s13 = sshll.u32 %s269_s12, 4  ;;  %s34_s15 = sshll.u32 %s270_s14, 4  ;;  %s23_s13 = int_to_ptr.vmem [resolvable:$true] %s22_s13  ;;  %s35_s15 = int_to_ptr.vmem [resolvable:$true] %s34_s15 }
   0x5   :  { %s189_s16 = scalar_lea.vmem %s23_s13, 16  ;;  %s193_s17 = scalar_lea.vmem %s23_s13, 32 }
   0x6   :  { %p190_p0 = scmp.ne.s32.totalorder %s23_s13, %s189_s16  ;;  %p194_p1 = scmp.lt.s32.totalorder %s23_s13, %s23_s13 }
   0x7   :  { %p195_p2 = scmp.lt.s32.totalorder %s193_s17, %s189_s16 }
   0x9   :  { %p196_p3 = por %p195_p2, %p194_p1 }
   0xb   :  { %p197_p4 = pnand %p196_p3, %p190_p0 }
   0xd   :  { %200 = shalt.err (!%p197_p4)
}
   0xe   :  { %25 = dma.hbm_to_vmem [thread:$0]  %s312_s0, 16, %s23_s13, [#allocation3]  }
   0xf   :  { %s209_s20 = scalar_lea.vmem %s35_s15, 256  ;;  %p214_p6 = scmp.lt.s32.totalorder %s35_s15, %s35_s15 }
  0x10   :  { %p210_p5 = scmp.ne.s32.totalorder %s35_s15, %s209_s20  ;;  %p215_p7 = scmp.lt.s32.totalorder %s209_s20, %s209_s20 }
  0x12   :  { %p216_p8 = por %p215_p7, %p214_p6 }
  0x14   :  { %p217_p9 = pnand %p216_p8, %p210_p5 }
  0x16   :  { %220 = shalt.err (!%p217_p9)
}
  0x17   :  { %s271_s21 = smov 128   ;;  %s272_s22 = smov 8  }
  0x18   :  { %40 = dma.hbm_to_vmem [thread:$0]  %s313_s1, 256, %s35_s15, [#allocation6], %s271_s21, %s271_s21, %s272_s22  }
  0x19   :  { %261 = dma.done.wait [#allocation3], 16  }
  0x1a   :  { %262 = vsyncadd [#allocation3], 4294967280 }
  0x1b   :  { %263 = dma.done.wait [#allocation6], 256  }
  0x1c   :  { %264 = vsyncadd [#allocation6], 4294967040  ;;  %vm53_vm0 = vcmask 0   ;;  %v76_v0 = vlaneseq  ;;  %v273_v1 = vmov 0.0   ;;  %v56_v4 = vld [vmem:[#allocation5] sm:$0xff]  ;;  %vm67_vm1 = vcmask 1041408  }
  0x1d   :  { %54 = vst.msk [vmem:[#allocation7] sm:$0x1] %vm53_vm0, %v273_v1  ;;  %55 = vst.msk [vmem:[#allocation8] sm:$0x1] %vm53_vm0, %v273_v1  ;;  %v57_v5 = vld [vmem:[#allocation5 + $0x8] sm:$0x3] }
  0x1e   :  { %v77_v2 = vshrl.u32 %v76_v0, 7  ;;  %v58_v6 = vld [vmem:[#allocation2] sm:$0x1]  ;;  %v59_v7 = vmul.f32 0.5, %v56_v4  ;;  %v60_v8 = vmul.f32 0.5, %v57_v5  ;;  %vm106_vm5 = vcmask 1040384  }
  0x1f   :  { %vm95_vm4 = vcmp.ne.s32.totalorder %v58_v6, 4294967295  ;;  %s274_s0 = smov [#allocation7]   ;;  %s275_s26 = smov [#allocation8]  }
  0x20   :  { %v81_v3 = vsub.s32 0, %v77_v2  ;;  %v78_v9 = vadd.s32 8, %v77_v2  ;;  %v61_v11 = vadd.f32 1.0, %v59_v7  ;;  %v62_v12 = vadd.f32 1.0, %v60_v8  ;;  %s141_s1 = sshll.u32 %s274_s0, 4  ;;  %s151_s27 = sshll.u32 %s275_s26, 4  ;;  %s142_s1 = int_to_ptr.vmem [resolvable:$true] %s141_s1  ;;  %s152_s27 = int_to_ptr.vmem [resolvable:$true] %s151_s27 }
  0x21   :  { %v165_v40 = vsel %vm95_vm4, 1.0, %v273_v1  ;;  %s221_s29 = scalar_lea.vmem %s142_s1, 16  ;;  %s225_s30 = scalar_lea.vmem %s142_s1, 32 }
  0x22   :  { %v82_v10 = vrot.slane %v58_v6, %v81_v3  ;;  %v63_v13 = vmul.f32 %v61_v11, %v56_v4  ;;  %v64_v14 = vmul.f32 %v62_v12, %v57_v5  ;;  %v122_v44 = vsel %vm106_vm5, %v165_v40, 0.0  ;;  %p222_p10 = scmp.ne.s32.totalorder %s142_s1, %s221_s29  ;;  %p226_p11 = scmp.lt.s32.totalorder %s142_s1, %s142_s1 }
  0x23   :  { %p227_p12 = scmp.lt.s32.totalorder %s225_s30, %s221_s29 }
  0x24   :  { %vm83_vm2 = vcmp.eq.s32.totalorder %v77_v2, %v82_v10  ;;  %vm84_vm3 = vcmp.eq.s32.totalorder %v78_v9, %v82_v10  ;;  %v65_v15 = vadd.f32 1.0, %v63_v13  ;;  %v66_v16 = vadd.f32 1.0, %v64_v14  ;;  %v105_v59 = vld [vmem:[#allocation7] sm:$0x1]  ;;  %v121_v62 = vld [vmem:[#allocation8] sm:$0x1] }
  0x25   :  { %p228_p13 = por %p227_p12, %p226_p11 }
  0x26   :  { %v68_v17 = vsel %vm67_vm1, %v66_v16, 0.0  ;;  %v85_v18 = vsel %vm83_vm2, %v65_v15, 0.0  ;;  %v86_v19 = vsel %vm84_vm3, %v66_v16, 0.0 }
  0x27   :  { %v69_v20 = vadd.f32 %v68_v17, %v65_v15  ;;  %v87_v21 = vsel %vm67_vm1, %v86_v19, 0.0  ;;  %p229_p0 = pnand %p228_p13, %p222_p10 }
  0x28   :  { %v88_v22 = vadd.f32 %v87_v21, %v85_v18 }
  0x29   :  { %v70_v23 = vrot.slane %v69_v20, 4 }
  0x2a   :  { %v89_v24 = vrot.slane %v88_v22, 4 }
  0x2b   :  { %v71_v25 = vadd.f32 %v70_v23, %v69_v20 }
  0x2c   :  { %v90_v26 = vadd.f32 %v89_v24, %v88_v22 }
  0x2d   :  { %v72_v27 = vrot.slane %v71_v25, 2 }
  0x2e   :  { %v91_v28 = vrot.slane %v90_v26, 2 }
  0x2f   :  { %v73_v29 = vadd.f32 %v72_v27, %v71_v25 }
  0x30   :  { %v92_v30 = vadd.f32 %v91_v28, %v90_v26 }
  0x31   :  { %v74_v31 = vrot.slane %v73_v29, 1 }
  0x32   :  { %v93_v32 = vrot.slane %v92_v30, 1 }
  0x33   :  { %v75_v33 = vadd.f32 %v74_v31, %v73_v29 }
  0x34   :  { %v94_v34 = vadd.f32 %v93_v32, %v92_v30 }
  0x35   :  { %177 = vlog2.f32 %v75_v33 }
  0x36   :  { %v98_v35 = vsel %vm95_vm4, %v94_v34, 1.0 }
  0x37   :  { %179 = vlog2.f32 %v98_v35 }
  0x42   :  { %v178_v36 = vpop.eup %177 }
  0x43   :  { %v100_v37 = vmul.f32 0.6931472, %v178_v36 }
  0x44   :  { %v180_v38 = vpop.eup %179 }
  0x45   :  { %v102_v39 = vmul.f32 0.6931472, %v180_v38 }
  0x47   :  { %v103_v41 = vsub.f32 %v100_v37, %v102_v39 }
  0x49   :  { %v104_v42 = vmul.f32 %v165_v40, %v103_v41 }
  0x4b   :  { %v107_v43 = vsel %vm106_vm5, %v104_v42, 0.0 }
  0x4c   :  { %108 = vadd.xlane.f32.xlu0 %v107_v43 }
  0x50   :  { %123 = vadd.xlane.f32.xlu0 %v122_v44 }
  0xd5   :  { %v109_v45 = vpop.xlane.xlu0 %108 }
  0xd6   :  { %v110_v46 = vrot.slane %v109_v45, 4 }
  0xd8   :  { %v111_v47 = vadd.f32 %v110_v46, %v109_v45 }
  0xd9   :  { %v124_v48 = vpop.xlane.xlu0 %123 }
  0xda   :  { %v112_v49 = vrot.slane %v111_v47, 2  ;;  %v125_v50 = vrot.slane %v124_v48, 4 }
  0xdc   :  { %v126_v51 = vadd.f32 %v125_v50, %v124_v48  ;;  %v113_v52 = vadd.f32 %v112_v49, %v111_v47 }
  0xde   :  { %v127_v53 = vrot.slane %v126_v51, 2  ;;  %v114_v54 = vrot.slane %v113_v52, 1 }
  0xe0   :  { %v128_v55 = vadd.f32 %v127_v53, %v126_v51  ;;  %v115_v56 = vadd.f32 %v114_v54, %v113_v52 }
  0xe2   :  { %166 = vpush %v115_v56  ;;  %v129_v57 = vrot.slane %v128_v55, 1 }
  0xe4   :  { %v130_v58 = vadd.f32 %v129_v57, %v128_v55 }
  0xe6   :  { %168 = vpush %v130_v58 }
 0x113   :  { %s167_s25 = spop %166 }
 0x114   :  { %v117_v60 = vstv %s167_s25 }
 0x115   :  { %v118_v61 = vadd.f32 %v117_v60, %v105_v59 }
 0x117   :  { %120 = vst.msk [vmem:[#allocation7] sm:$0x1] %vm53_vm0, %v118_v61  ;;  %s169_s28 = spop %168 }
 0x118   :  { %v132_v63 = vstv %s169_s28 }
 0x119   :  { %232 = shalt.err (!%p229_p0)
}
 0x11a   :  { %144 = dma.vmem_to_hbm [thread:$0]  %s142_s1, 16, %s314_s2, [#allocation4]   ;;  %v133_v0 = vadd.f32 %v132_v63, %v121_v62 }
 0x11b   :  { %s241_s6 = scalar_lea.vmem %s152_s27, 16  ;;  %s245_s7 = scalar_lea.vmem %s152_s27, 32 }
 0x11c   :  { %134 = vst.msk [vmem:[#allocation8] sm:$0x1] %vm53_vm0, %v133_v0  ;;  %p242_p1 = scmp.ne.s32.totalorder %s152_s27, %s241_s6  ;;  %p246_p2 = scmp.lt.s32.totalorder %s152_s27, %s152_s27 }
 0x11d   :  { %p247_p3 = scmp.lt.s32.totalorder %s245_s7, %s241_s6 }
 0x11f   :  { %p248_p4 = por %p247_p3, %p246_p2 }
 0x121   :  { %p249_p5 = pnand %p248_p4, %p242_p1 }
 0x123   :  { %252 = shalt.err (!%p249_p5)
}
 0x124   :  { %154 = dma.vmem_to_hbm [thread:$0]  %s152_s27, 16, %s315_s3, [#allocation9]  }
 0x125   :  { %265 = dma.done.wait [#allocation4], 16  }
 0x126   :  { %266 = vsyncadd [#allocation4], 4294967280 }
 0x127   :  { %267 = dma.done.wait [#allocation9], 16  }
 0x128   :  { %268 = vsyncadd [#allocation9], 4294967280 }
 0x129   :  { %161 = vsyncpa [#allocation3], 1 }
 0x12a   :  { %162 = vsyncpa [#allocation6], 1 }
 0x12b   :  { %163 = vsyncpa [#allocation4], 1 }
 0x12c   :  { %164 = vsyncpa [#allocation9], 1 }

</bundles_post_ra>
